<compile_context>
chip_gen: v6e
topology: v6e:2x2x1
jax: 0.10.0
libtpu: 0.0.40
codegen_flags: <defaults>
</compile_context>

<pallas_src>
import functools
import math

import jax
import jax.numpy as jnp
from jax import lax
from jax.experimental import pallas as pl
from jax.experimental.pallas import tpu as pltpu


# ----------------------------------------------------------------------------
# small shared helpers (used identically inside kernels and in the references
# so that numerics line up)
# ----------------------------------------------------------------------------
def _round_up(x, m):
    return (x + m - 1) // m * m


def _sigmoid(x):
    return 1.0 / (1.0 + jnp.exp(-x))


def _int_pow(x, n):
    """x ** n for a static Python int n, via exponentiation by squaring."""
    acc = jnp.ones_like(x)
    cur = x
    e = int(n)
    while e > 0:
        if e & 1:
            acc = acc * cur
        e >>= 1
        if e:
            cur = cur * cur
    return acc


# ----------------------------------------------------------------------------
# Kernel 1: fused LayerNorm + N-layer MLP  (decoder_norm + mask_embed head)
# ----------------------------------------------------------------------------
def _ln_mlp_kernel(x_ref, g_ref, beta_ref, *rest, num_layers, eps):
    # rest = (w1, b1, w2, b2, ..., wN, bN, o_ref)
    o_ref = rest[-1]
    x = x_ref[...]
    mu = jnp.mean(x, axis=-1, keepdims=True)
    var = jnp.mean(jnp.square(x - mu), axis=-1, keepdims=True)
    h = (x - mu) * lax.rsqrt(var + eps) * g_ref[...] + beta_ref[...]
    for l in range(num_layers):
        w = rest[2 * l][...]
        b = rest[2 * l + 1][...]
        h = jnp.dot(h, w, preferred_element_type=jnp.float32) + b
        if l < num_layers - 1:
            h = jnp.maximum(h, 0.0)
    o_ref[...] = h.astype(o_ref.dtype)


def ln_mlp_pallas(x2d, gamma, beta, layers, *, eps, tm=128):
    """Fused LayerNorm + MLP over rows.

    x2d: (M, d_in); layers: list of (W_t[(in,out)], b[(out,)]).  Whole MLP is a
    single pallas_call: all weights stay resident in VMEM (constant index_map),
    layer-to-layer activations never touch HBM, only the final output is stored.
    Rows are tiled with tm=128 (full MXU rows); M is padded up with cdiv-style
    padding instead of asserting divisibility.
    """
    M, d_in = x2d.shape
    d_out = layers[-1][0].shape[1]
    Mp = _round_up(M, tm)
    if Mp != M:
        x2d = jnp.pad(x2d, ((0, Mp - M), (0, 0)))

    in_specs = [
        pl.BlockSpec((tm, d_in), lambda i: (i, 0)),
        pl.BlockSpec((1, d_in), lambda i: (0, 0)),
        pl.BlockSpec((1, d_in), lambda i: (0, 0)),
    ]
    args = [x2d, gamma.reshape(1, d_in), beta.reshape(1, d_in)]
    for w, b in layers:
        in_specs.append(pl.BlockSpec(w.shape, lambda i: (0, 0)))
        in_specs.append(pl.BlockSpec((1, b.shape[0]), lambda i: (0, 0)))
        args.append(w)
        args.append(b.reshape(1, -1))

    out = pl.pallas_call(
        functools.partial(_ln_mlp_kernel, num_layers=len(layers), eps=eps),
        out_shape=jax.ShapeDtypeStruct((Mp, d_out), x2d.dtype),
        grid_spec=pltpu.PrefetchScalarGridSpec(
            num_scalar_prefetch=0,
            grid=(Mp // tm,),
            in_specs=in_specs,
            out_specs=pl.BlockSpec((tm, d_out), lambda i: (i, 0)),
        ),
        compiler_params=pltpu.CompilerParams(dimension_semantics=("parallel",)),
    )(*args)
    return out[:M]


# ----------------------------------------------------------------------------
# Kernel 2: Boltzmann attention mask
#   scores = sigmoid(mask_embed @ mask_embed^T / sqrt(d))   (once per batch,
#   cached in VMEM scratch), then per-head Boltzmann sampling with that head's
#   random tensor.
# ----------------------------------------------------------------------------
def _boltzmann_kernel(me_ref, rand_ref, o_ref, s_ref, *,
                      scale, inv_temp, threshold, n_samples):
    h = pl.program_id(1)

    @pl.when(h == 0)
    def _():
        me = me_ref[0]                                            # (Qp, D)
        s = lax.dot_general(me, me, (((1,), (1,)), ((), ())),
                            preferred_element_type=jnp.float32) * scale
        s_ref[...] = _sigmoid(s)                                  # (Qp, Qp)

    a = s_ref[...]
    bp = jnp.exp(a * inv_temp) * (a < threshold).astype(jnp.float32)
    bp = bp / (jnp.sum(bp, axis=-1, keepdims=True) + 1e-6)
    masked_prob = _int_pow(1.0 - bp, n_samples)
    r = rand_ref[0]
    boltz_mask = 1.0 - _sigmoid((r - masked_prob) * 100.0)
    out = (1.0 - _sigmoid((a - threshold) * 100.0)) * boltz_mask
    o_ref[0] = out.astype(o_ref.dtype)


def boltzmann_mask_pallas(mask_embed, rand, *, num_heads, layer_id,
                          threshold=0.5, sample_ratio=0.1, base_temp=1.0):
    """mask_embed: (B, Q, D); rand: (B*num_heads, Q, Q) -> (B*num_heads, Q, Q)."""
    B, Q, D = mask_embed.shape
    BH = B * num_heads
    assert rand.shape == (BH, Q, Q)

    # Pad Q up to a lane-dense multiple of 128.  Zero-padded key rows give
    # scores sigmoid(0)=0.5 which fail the (< 0.5) threshold, so they do not
    # perturb the per-row Boltzmann normalization of real rows.
    Qp = _round_up(Q, 128)
    me = mask_embed if Qp == Q else jnp.pad(mask_embed, ((0, 0), (0, Qp - Q), (0, 0)))
    rp = rand if Qp == Q else jnp.pad(rand, ((0, 0), (0, Qp - Q), (0, Qp - Q)))

    temp = base_temp / (2 + layer_id)
    kernel = functools.partial(
        _boltzmann_kernel,
        scale=1.0 / math.sqrt(D),
        inv_temp=1.0 / temp,
        threshold=float(threshold),
        n_samples=int(Q * sample_ratio),
    )
    out = pl.pallas_call(
        kernel,
        out_shape=jax.ShapeDtypeStruct((BH, Qp, Qp), jnp.float32),
        grid_spec=pltpu.PrefetchScalarGridSpec(
            num_scalar_prefetch=0,
            grid=(B, num_heads),                    # heads innermost: scores reused
            in_specs=[
                pl.BlockSpec((1, Qp, D), lambda b, h: (b, 0, 0)),
                pl.BlockSpec((1, Qp, Qp), lambda b, h: (b * num_heads + h, 0, 0)),
            ],
            out_specs=pl.BlockSpec((1, Qp, Qp), lambda b, h: (b * num_heads + h, 0, 0)),
            scratch_shapes=[pltpu.VMEM((Qp, Qp), jnp.float32)],
        ),
        compiler_params=pltpu.CompilerParams(
            dimension_semantics=("parallel", "arbitrary")),
    )(me, rp)
    return out[:, :Q, :Q]


def boltzmann_attn_mask(tgt_mask, params, rand, layer_id):
    """Full BoltzformerDecoder.boltzmann(): LN -> mask_embed MLP -> Boltzmann mask."""
    B, Q, d_model = tgt_mask.shape
    cfg = params["boltzmann_sampling"]
    me2d = ln_mlp_pallas(
        tgt_mask.reshape(B * Q, d_model),
        params["decoder_norm"]["gamma"], params["decoder_norm"]["beta"],
        params["mask_embed"], eps=1e-4)
    mask_embed = me2d.reshape(B, Q, me2d.shape[-1])
    attn = boltzmann_mask_pallas(
        mask_embed, rand,
        num_heads=params["num_heads"], layer_id=layer_id,
        threshold=cfg["mask_threshold"], sample_ratio=cfg["sample_ratio"],
        base_temp=cfg["base_temp"])
    return attn, mask_embed


# ----------------------------------------------------------------------------
# Kernel 3: fused transformer FFN (forward_ffn):
#   linear1 -> ReLU -> linear2 -> +residual -> LayerNorm, one pallas_call.
# ----------------------------------------------------------------------------
def _ffn_kernel(x_ref, w1_ref, b1_ref, w2_ref, b2_ref, g_ref, be_ref, o_ref, *, eps):
    x = x_ref[...]
    h = jnp.dot(x, w1_ref[...], preferred_element_type=jnp.float32) + b1_ref[...]
    h = jnp.maximum(h, 0.0)
    y = jnp.dot(h, w2_ref[...], preferred_element_type=jnp.float32) + b2_ref[...]
    y = x + y                                    # residual (dropout == identity)
    mu = jnp.mean(y, axis=-1, keepdims=True)
    var = jnp.mean(jnp.square(y - mu), axis=-1, keepdims=True)
    o_ref[...] = ((y - mu) * lax.rsqrt(var + eps) * g_ref[...] + be_ref[...]
                  ).astype(o_ref.dtype)


def ffn_pallas(x, w1, b1, w2, b2, gamma, beta, *, eps=1e-5, tm=128):
    lead = x.shape[:-1]
    d_model = x.shape[-1]
    d_ffn = w1.shape[1]
    x2d = x.reshape(-1, d_model)
    M = x2d.shape[0]
    Mp = _round_up(M, tm)
    if Mp != M:
        x2d = jnp.pad(x2d, ((0, Mp - M), (0, 0)))
    out = pl.pallas_call(
        functools.partial(_ffn_kernel, eps=eps),
        out_shape=jax.ShapeDtypeStruct((Mp, d_model), x.dtype),
        grid_spec=pltpu.PrefetchScalarGridSpec(
            num_scalar_prefetch=0,
            grid=(Mp // tm,),
            in_specs=[
                pl.BlockSpec((tm, d_model), lambda i: (i, 0)),
                pl.BlockSpec((d_model, d_ffn), lambda i: (0, 0)),
                pl.BlockSpec((1, d_ffn), lambda i: (0, 0)),
                pl.BlockSpec((d_ffn, d_model), lambda i: (0, 0)),
                pl.BlockSpec((1, d_model), lambda i: (0, 0)),
                pl.BlockSpec((1, d_model), lambda i: (0, 0)),
                pl.BlockSpec((1, d_model), lambda i: (0, 0)),
            ],
            out_specs=pl.BlockSpec((tm, d_model), lambda i: (i, 0)),
        ),
        compiler_params=pltpu.CompilerParams(dimension_semantics=("parallel",)),
    )(x2d, w1, b1.reshape(1, -1), w2, b2.reshape(1, -1),
      gamma.reshape(1, -1), beta.reshape(1, -1))
    return out[:M].reshape(*lead, d_model)


# ----------------------------------------------------------------------------
# parameter init + pure-JAX references
# ----------------------------------------------------------------------------
def init_params(key, d_model, mask_dim, d_ffn, num_heads):
    def linear(k, fan_in, fan_out):
        kw, kb = jax.random.split(k)
        bound = 1.0 / math.sqrt(fan_in)
        w = jax.random.uniform(kw, (fan_in, fan_out), jnp.float32, -bound, bound)
        b = jax.random.uniform(kb, (fan_out,), jnp.float32, -bound, bound)
        return w, b

    keys = jax.random.split(key, 9)
    mlp_dims = [(d_model, d_model), (d_model, d_model), (d_model, mask_dim)]
    mask_embed = [linear(keys[i], n, k) for i, (n, k) in enumerate(mlp_dims)]
    w1, b1 = linear(keys[3], d_model, d_ffn)
    w2, b2 = linear(keys[4], d_ffn, d_model)
    return {
        "num_heads": num_heads,
        "decoder_norm": {
            "gamma": 1.0 + 0.1 * jax.random.normal(keys[5], (d_model,), jnp.float32),
            "beta": 0.1 * jax.random.normal(keys[6], (d_model,), jnp.float32),
        },
        "mask_embed": mask_embed,
        "ffn": {
            "w1": w1, "b1": b1, "w2": w2, "b2": b2,
            "gamma": 1.0 + 0.1 * jax.random.normal(keys[7], (d_model,), jnp.float32),
            "beta": 0.1 * jax.random.normal(keys[8], (d_model,), jnp.float32),
        },
        "boltzmann_sampling": {"mask_threshold": 0.5, "do_boltzmann": True,
                               "sample_ratio": 0.1, "base_temp": 1.0},
    }


def _layer_norm_ref(x, gamma, beta, eps):
    mu = jnp.mean(x, axis=-1, keepdims=True)
    var = jnp.mean(jnp.square(x - mu), axis=-1, keepdims=True)
    return (x - mu) / jnp.sqrt(var + eps) * gamma + beta


def mask_embed_reference(tgt_mask, params):
    x = _layer_norm_ref(tgt_mask, params["decoder_norm"]["gamma"],
                        params["decoder_norm"]["beta"], 1e-4)
    layers = params["mask_embed"]
    for i, (w, b) in enumerate(layers):
        x = x @ w + b
        if i < len(layers) - 1:
            x = jnp.maximum(x, 0.0)
    return x


def boltzmann_reference(tgt_mask, params, rand, layer_id):
    cfg = params["boltzmann_sampling"]
    me = mask_embed_reference(tgt_mask, params)
    B, Q, D = me.shape
    H = params["num_heads"]
    attn = jnp.einsum("bqd,bkd->bqk", me, me) / math.sqrt(D)
    attn = _sigmoid(attn)
    attn = jnp.broadcast_to(attn[:, None], (B, H, Q, Q)).reshape(B * H, Q, Q)
    temp = cfg["base_temp"] / (2 + layer_id)
    bp = jnp.exp(attn / temp) * (attn < cfg["mask_threshold"]).astype(jnp.float32)
    bp = bp / (jnp.sum(bp, axis=-1, keepdims=True) + 1e-6)
    masked_prob = _int_pow(1.0 - bp, int(Q * cfg["sample_ratio"]))
    boltz_mask = 1.0 - _sigmoid((rand - masked_prob) * 100.0)
    return (1.0 - _sigmoid((attn - cfg["mask_threshold"]) * 100.0)) * boltz_mask


def ffn_reference(x, p):
    h = jnp.maximum(x @ p["w1"] + p["b1"], 0.0)
    y = x + (h @ p["w2"] + p["b2"])
    return _layer_norm_ref(y, p["gamma"], p["beta"], 1e-5)


# ----------------------------------------------------------------------------
if __name__ == "__main__":
    key = jax.random.PRNGKey(0)
    k_params, k_tgt, k_rand = jax.random.split(key, 3)

    # small, module-consistent shapes (real defaults: d_model=256, d_ffn=1024)
    batch, num_queries, d_model, mask_dim, d_ffn, num_heads = 2, 100, 128, 128, 256, 8
    params = init_params(k_params, d_model, mask_dim, d_ffn, num_heads)

    tgt_mask = jax.random.normal(k_tgt, (batch, num_queries, d_model), jnp.float32)
    rand = jax.random.uniform(
        k_rand, (batch * num_heads, num_queries, num_queries), jnp.float32)

    attn_mask, mask_embed = boltzmann_attn_mask(tgt_mask, params, rand, layer_id=-1)
    ffn_out = ffn_pallas(tgt_mask, params["ffn"]["w1"], params["ffn"]["b1"],
                         params["ffn"]["w2"], params["ffn"]["b2"],
                         params["ffn"]["gamma"], params["ffn"]["beta"])
    attn_mask, mask_embed, ffn_out = jax.block_until_ready(
        (attn_mask, mask_embed, ffn_out))

    # --- correctness vs pure-JAX references ---------------------------------
    me_ref = mask_embed_reference(tgt_mask, params)
    assert mask_embed.shape == (batch, num_queries, mask_dim), mask_embed.shape
    assert jnp.allclose(mask_embed, me_ref, atol=1e-3, rtol=1e-3), "mask_embed mismatch"

    ffn_ref = ffn_reference(tgt_mask, params["ffn"])
    assert ffn_out.shape == tgt_mask.shape, ffn_out.shape
    assert jnp.allclose(ffn_out, ffn_ref, atol=1e-3, rtol=1e-3), "ffn mismatch"

    am_ref = boltzmann_reference(tgt_mask, params, rand, layer_id=-1)
    assert attn_mask.shape == (batch * num_heads, num_queries, num_queries), attn_mask.shape
    diff = jnp.abs(attn_mask - am_ref)
    # The *100 sigmoids amplify ulp-level matmul differences for scores that sit
    # exactly on the 0.5 threshold, so allow a vanishing fraction of outliers.
    assert float(jnp.mean(diff)) < 1e-3, float(jnp.mean(diff))
    assert float(jnp.mean((diff > 2e-2).astype(jnp.float32))) < 1e-3, "boltzmann mask mismatch"

    print("KERNEL_OK")
</pallas_src>

<mosaic_0001>
module attributes {stable_mosaic.version = 11 : i64} {
  func.func @_ln_mlp_kernel(%arg0: i32, %arg1: memref<128x128xf32, #tpu.memory_space<vmem>>, %arg2: memref<1x128xf32, #tpu.memory_space<vmem>>, %arg3: memref<1x128xf32, #tpu.memory_space<vmem>>, %arg4: memref<128x128xf32, #tpu.memory_space<vmem>>, %arg5: memref<1x128xf32, #tpu.memory_space<vmem>>, %arg6: memref<128x128xf32, #tpu.memory_space<vmem>>, %arg7: memref<1x128xf32, #tpu.memory_space<vmem>>, %arg8: memref<128x128xf32, #tpu.memory_space<vmem>>, %arg9: memref<1x128xf32, #tpu.memory_space<vmem>>, %arg10: memref<128x128xf32, #tpu.memory_space<vmem>>) attributes {dimension_semantics = [#tpu.dimension_semantics<parallel>], iteration_bounds = array<i64: 2>, scalar_prefetch = 0 : i64, scratch_operands = 0 : i64, tpu.core_type = #tpu.core_type<tc>, window_params = [{transform_indices = @transform_0, window_bounds = array<i64: 128, 128>}, {pipeline_mode = #tpu.pipeline_mode<synchronous>, transform_indices = @transform_1, window_bounds = array<i64: 1, 128>}, {pipeline_mode = #tpu.pipeline_mode<synchronous>, transform_indices = @transform_2, window_bounds = array<i64: 1, 128>}, {pipeline_mode = #tpu.pipeline_mode<synchronous>, transform_indices = @transform_3, window_bounds = array<i64: 128, 128>}, {pipeline_mode = #tpu.pipeline_mode<synchronous>, transform_indices = @transform_4, window_bounds = array<i64: 1, 128>}, {pipeline_mode = #tpu.pipeline_mode<synchronous>, transform_indices = @transform_5, window_bounds = array<i64: 128, 128>}, {pipeline_mode = #tpu.pipeline_mode<synchronous>, transform_indices = @transform_6, window_bounds = array<i64: 1, 128>}, {pipeline_mode = #tpu.pipeline_mode<synchronous>, transform_indices = @transform_7, window_bounds = array<i64: 128, 128>}, {pipeline_mode = #tpu.pipeline_mode<synchronous>, transform_indices = @transform_8, window_bounds = array<i64: 1, 128>}, {transform_indices = @transform_9, window_bounds = array<i64: 128, 128>}]} {
    %c0 = arith.constant 0 : index
    %c0_0 = arith.constant 0 : index
    %0 = vector.load %arg1[%c0, %c0_0] : memref<128x128xf32, #tpu.memory_space<vmem>>, vector<128x128xf32>
    %cst = arith.constant dense<0.000000e+00> : vector<128xf32>
    %1 = vector.multi_reduction <add>, %0, %cst [1] : vector<128x128xf32> to vector<128xf32>
    %2 = vector.shape_cast %1 : vector<128xf32> to vector<128x1xf32>
    %cst_1 = arith.constant 1.280000e+02 : f32
    %3 = vector.broadcast %cst_1 : f32 to vector<128x1xf32>
    %4 = arith.divf %2, %3 : vector<128x1xf32>
    %5 = vector.broadcast %4 : vector<128x1xf32> to vector<128x128xf32>
    %6 = arith.subf %0, %5 : vector<128x128xf32>
    %7 = arith.mulf %6, %6 : vector<128x128xf32>
    %cst_2 = arith.constant dense<0.000000e+00> : vector<128xf32>
    %8 = vector.multi_reduction <add>, %7, %cst_2 [1] : vector<128x128xf32> to vector<128xf32>
    %9 = vector.shape_cast %8 : vector<128xf32> to vector<128x1xf32>
    %cst_3 = arith.constant 1.280000e+02 : f32
    %10 = vector.broadcast %cst_3 : f32 to vector<128x1xf32>
    %11 = arith.divf %9, %10 : vector<128x1xf32>
    %12 = vector.broadcast %4 : vector<128x1xf32> to vector<128x128xf32>
    %13 = arith.subf %0, %12 : vector<128x128xf32>
    %cst_4 = arith.constant 9.99999974E-5 : f32
    %14 = vector.broadcast %cst_4 : f32 to vector<128x1xf32>
    %15 = arith.addf %11, %14 : vector<128x1xf32>
    %16 = math.rsqrt %15 : vector<128x1xf32>
    %17 = vector.broadcast %16 : vector<128x1xf32> to vector<128x128xf32>
    %18 = arith.mulf %13, %17 : vector<128x128xf32>
    %c0_5 = arith.constant 0 : index
    %c0_6 = arith.constant 0 : index
    %19 = vector.load %arg2[%c0_5, %c0_6] : memref<1x128xf32, #tpu.memory_space<vmem>>, vector<1x128xf32>
    %20 = vector.broadcast %19 : vector<1x128xf32> to vector<128x128xf32>
    %21 = arith.mulf %18, %20 : vector<128x128xf32>
    %c0_7 = arith.constant 0 : index
    %c0_8 = arith.constant 0 : index
    %22 = vector.load %arg3[%c0_7, %c0_8] : memref<1x128xf32, #tpu.memory_space<vmem>>, vector<1x128xf32>
    %23 = vector.broadcast %22 : vector<1x128xf32> to vector<128x128xf32>
    %24 = arith.addf %21, %23 : vector<128x128xf32>
    %c0_9 = arith.constant 0 : index
    %c0_10 = arith.constant 0 : index
    %25 = vector.load %arg4[%c0_9, %c0_10] : memref<128x128xf32, #tpu.memory_space<vmem>>, vector<128x128xf32>
    %c0_11 = arith.constant 0 : index
    %c0_12 = arith.constant 0 : index
    %26 = vector.load %arg5[%c0_11, %c0_12] : memref<1x128xf32, #tpu.memory_space<vmem>>, vector<1x128xf32>
    %cst_13 = arith.constant dense<0.000000e+00> : vector<128x128xf32>
    %27 = tpu.matmul %24, %25, %cst_13 {dimension_numbers = #tpu.dot_dimension_numbers<[1], [0], [0], [1], [0, 0, 1, 1], [], []>} : vector<128x128xf32>, vector<128x128xf32>, vector<128x128xf32> -> vector<128x128xf32>
    %28 = vector.broadcast %26 : vector<1x128xf32> to vector<128x128xf32>
    %29 = arith.addf %27, %28 : vector<128x128xf32>
    %cst_14 = arith.constant 0.000000e+00 : f32
    %30 = vector.broadcast %cst_14 : f32 to vector<128x128xf32>
    %31 = arith.maximumf %29, %30 : vector<128x128xf32>
    %c0_15 = arith.constant 0 : index
    %c0_16 = arith.constant 0 : index
    %32 = vector.load %arg6[%c0_15, %c0_16] : memref<128x128xf32, #tpu.memory_space<vmem>>, vector<128x128xf32>
    %c0_17 = arith.constant 0 : index
    %c0_18 = arith.constant 0 : index
    %33 = vector.load %arg7[%c0_17, %c0_18] : memref<1x128xf32, #tpu.memory_space<vmem>>, vector<1x128xf32>
    %cst_19 = arith.constant dense<0.000000e+00> : vector<128x128xf32>
    %34 = tpu.matmul %31, %32, %cst_19 {dimension_numbers = #tpu.dot_dimension_numbers<[1], [0], [0], [1], [0, 0, 1, 1], [], []>} : vector<128x128xf32>, vector<128x128xf32>, vector<128x128xf32> -> vector<128x128xf32>
    %35 = vector.broadcast %33 : vector<1x128xf32> to vector<128x128xf32>
    %36 = arith.addf %34, %35 : vector<128x128xf32>
    %cst_20 = arith.constant 0.000000e+00 : f32
    %37 = vector.broadcast %cst_20 : f32 to vector<128x128xf32>
    %38 = arith.maximumf %36, %37 : vector<128x128xf32>
    %c0_21 = arith.constant 0 : index
    %c0_22 = arith.constant 0 : index
    %39 = vector.load %arg8[%c0_21, %c0_22] : memref<128x128xf32, #tpu.memory_space<vmem>>, vector<128x128xf32>
    %c0_23 = arith.constant 0 : index
    %c0_24 = arith.constant 0 : index
    %40 = vector.load %arg9[%c0_23, %c0_24] : memref<1x128xf32, #tpu.memory_space<vmem>>, vector<1x128xf32>
    %cst_25 = arith.constant dense<0.000000e+00> : vector<128x128xf32>
    %41 = tpu.matmul %38, %39, %cst_25 {dimension_numbers = #tpu.dot_dimension_numbers<[1], [0], [0], [1], [0, 0, 1, 1], [], []>} : vector<128x128xf32>, vector<128x128xf32>, vector<128x128xf32> -> vector<128x128xf32>
    %42 = vector.broadcast %40 : vector<1x128xf32> to vector<128x128xf32>
    %43 = arith.addf %41, %42 : vector<128x128xf32>
    %c0_26 = arith.constant 0 : index
    %c0_27 = arith.constant 0 : index
    %44 = vector.load %arg10[%c0_26, %c0_27] : memref<128x128xf32, #tpu.memory_space<vmem>>, vector<128x128xf32>
    tpu.vector_store %arg10[%c0_26, %c0_27], %43 {strides = array<i32>} : memref<128x128xf32, #tpu.memory_space<vmem>>, vector<128x128xf32>,
    return
  }
  func.func @transform_0(%arg0: i32) -> (i32, i32) {
    %c0_i32 = arith.constant 0 : i32
    %c0_i32_0 = arith.constant 0 : i32
    return %arg0, %c0_i32 : i32, i32
  }
  func.func @transform_1(%arg0: i32) -> (i32, i32) {
    %c0_i32 = arith.constant 0 : i32
    %c0_i32_0 = arith.constant 0 : i32
    %c0_i32_1 = arith.constant 0 : i32
    return %c0_i32, %c0_i32_0 : i32, i32
  }
  func.func @transform_2(%arg0: i32) -> (i32, i32) {
    %c0_i32 = arith.constant 0 : i32
    %c0_i32_0 = arith.constant 0 : i32
    %c0_i32_1 = arith.constant 0 : i32
    return %c0_i32, %c0_i32_0 : i32, i32
  }
  func.func @transform_3(%arg0: i32) -> (i32, i32) {
    %c0_i32 = arith.constant 0 : i32
    %c0_i32_0 = arith.constant 0 : i32
    %c0_i32_1 = arith.constant 0 : i32
    return %c0_i32, %c0_i32_0 : i32, i32
  }
  func.func @transform_4(%arg0: i32) -> (i32, i32) {
    %c0_i32 = arith.constant 0 : i32
    %c0_i32_0 = arith.constant 0 : i32
    %c0_i32_1 = arith.constant 0 : i32
    return %c0_i32, %c0_i32_0 : i32, i32
  }
  func.func @transform_5(%arg0: i32) -> (i32, i32) {
    %c0_i32 = arith.constant 0 : i32
    %c0_i32_0 = arith.constant 0 : i32
    %c0_i32_1 = arith.constant 0 : i32
    return %c0_i32, %c0_i32_0 : i32, i32
  }
  func.func @transform_6(%arg0: i32) -> (i32, i32) {
    %c0_i32 = arith.constant 0 : i32
    %c0_i32_0 = arith.constant 0 : i32
    %c0_i32_1 = arith.constant 0 : i32
    return %c0_i32, %c0_i32_0 : i32, i32
  }
  func.func @transform_7(%arg0: i32) -> (i32, i32) {
    %c0_i32 = arith.constant 0 : i32
    %c0_i32_0 = arith.constant 0 : i32
    %c0_i32_1 = arith.constant 0 : i32
    return %c0_i32, %c0_i32_0 : i32, i32
  }
  func.func @transform_8(%arg0: i32) -> (i32, i32) {
    %c0_i32 = arith.constant 0 : i32
    %c0_i32_0 = arith.constant 0 : i32
    %c0_i32_1 = arith.constant 0 : i32
    return %c0_i32, %c0_i32_0 : i32, i32
  }
  func.func @transform_9(%arg0: i32) -> (i32, i32) {
    %c0_i32 = arith.constant 0 : i32
    %c0_i32_0 = arith.constant 0 : i32
    return %arg0, %c0_i32 : i32, i32
  }
}

</mosaic_0001>

<bundles_post_ra>
// kernel: tpu_custom_call.1
= control target key start
LH: loop header
LB: loop body
LE: loop exit
PB: predicated region body
PF: predicated region fallthrough
CT: control target
= control target key end

     0   :  { %s2461_s0 = inlined_call_operand.hbm [shape: f32[256,128], index: 0, kind: input, shape index: {}]   ;;  %s2462_s1 = inlined_call_operand.vmem [shape: f32[1,128], index: 1, kind: input, shape index: {}]   ;;  %s2463_s2 = inlined_call_operand.vmem [shape: f32[1,128], index: 2, kind: input, shape index: {}]   ;;  %s2464_s3 = inlined_call_operand.hbm [shape: f32[128,128], index: 3, kind: input, shape index: {}]   ;;  %s2465_s4 = inlined_call_operand.vmem [shape: f32[1,128], index: 4, kind: input, shape index: {}]   ;;  %s2466_s5 = inlined_call_operand.hbm [shape: f32[128,128], index: 5, kind: input, shape index: {}]   ;;  %s2467_s6 = inlined_call_operand.vmem [shape: f32[1,128], index: 6, kind: input, shape index: {}]   ;;  %s2468_s7 = inlined_call_operand.hbm [shape: f32[128,128], index: 7, kind: input, shape index: {}]   ;;  %s2469_s8 = inlined_call_operand.vmem [shape: f32[1,128], index: 8, kind: input, shape index: {}]   ;;  %s2470_s9 = inlined_call_operand.hbm [shape: f32[256,128], index: 9, kind: output, shape index: {}]  }
   0x1   :  { %2477 = sst [smem:[#allocation15_spill]] %s2464_s3 }
   0x2   :  { %2478 = sst [smem:[#allocation16_spill]] %s2466_s5 }
   0x3   :  { %2479 = sst [smem:[#allocation17_spill]] %s2468_s7 }
   0x4   :  { %14 = vsyncpa [#allocation3], 0 }
   0x5   :  { %16 = vsyncpa [#allocation3 + $0x1], 0 }
   0x6   :  { %17 = vsyncpa [#allocation6], 0 }
   0x7   :  { %18 = vsyncpa [#allocation9], 0 }
   0x8   :  { %19 = vsyncpa [#allocation4], 0 }
   0x9   :  { %21 = vsyncpa [#allocation4 + $0x1], 0  ;;  %s1979_s30 = smov 0   ;;  %s1981_s10 = smov 0  }
   0xa   :  { %s1983_s11 = smov 0   ;;  %s1985_s12 = smov 0  }
   0xb LB: > { %s2000_s13 = sadd.s32 4294967295, %s1918_s12   ;;  %s1304_s14 = sadd.s32 4294967294, %s1918_s12   ;;  %s1918_s12 = sphi %s1985_s12, %s2503_s12   ;;  %s1914_s11 = sphi %s1983_s11, %s2502_s11   ;;  %s1910_s10 = sphi %s1981_s10, %s2501_s10   ;;  %s1906_s30 = sphi %s1979_s30, %s2500_s30  }
   0xc   : > { %p47_p0 = scmp.ne.s32.totalorder %s1910_s10, %s1906_s30  ;;  %p2471_p1 = scmp.eq.s32.totalorder %s2000_s13, 0 }
   0xd   : > { %p239_p2 = scmp.eq.s32.totalorder %s2000_s13, 1  ;;  %p245_p3 = scmp.eq.s32.totalorder %s1304_s14, 1 }
   0xe   : > { %p2009_p4 = por %p2471_p1, %p47_p0  ;;  %p1305_p5 = scmp.ge.s32.totalorder %s1918_s12, 1 }
   0xf   : > { %p2014_p6 = por %p245_p3, %p47_p0  ;;  %p252_p7 = scmp.lt.s32.totalorder %s1918_s12, 3 }
  0x10   : > { %s2480_s15 = scalar_select %p2009_p4, 1, 0 }
  0x11   : > { %s2481_s16 = scalar_select %p2014_p6, 1, 0 }
  0x12   : > { %p2019_p8 = pnand %p1305_p5, %p252_p7  ;;  %s1920_s18 = smov [#allocation5]  }
  0x13   : > { %s270_s19 = sshll.u32 %s1920_s18, 4  ;;  %s1921_s21 = smov [#allocation7]   ;;  %s271_s19 = int_to_ptr.vmem [resolvable:$true] %s270_s19 }
  0x14   : > { %s2482_s17 = scalar_select %p2019_p8, 1, 0 }
  0x15   : > { %p1643_p9 = pneg %p2019_p8  ;;  %s286_s22 = sshll.u32 %s1921_s21, 4  ;;  %s287_s22 = int_to_ptr.vmem [resolvable:$true] %s286_s22 }
  0x16   : > { %s1922_s23 = smov [#allocation8]   ;;  %s1751_s25 = scalar_lea.vmem %s271_s19, 2048 }
  0x17   : > { %p2028_p11 = pnand %p1643_p9, %p2471_p1  ;;  %s302_s24 = sshll.u32 %s1922_s23, 4  ;;  %s303_s24 = int_to_ptr.vmem [resolvable:$true] %s302_s24 }
  0x18   : > { %p1752_p13 = scmp.ne.s32.totalorder %s271_s19, %s1751_s25  ;;  %p1759_p5 = scmp.lt.s32.totalorder %s271_s19, %s271_s19 }
  0x19   : > { %p1742_p12 = pneg %p2028_p11  ;;  %p1760_p7 = scmp.lt.s32.totalorder %s1751_s25, %s1751_s25 }
  0x1b   : > { %p1754_p0 = pnand %p1752_p13, %p1742_p12  ;;  %p1761_p9 = por %p1760_p7, %p1759_p5 }
  0x1d   : > { %p1755_p3 = pneg %p1754_p0 }
  0x1f   : > { %p1762_p10 = pnand %p1761_p9, %p1755_p3 }
  0x21   : > { %1765 = shalt.err (!%p1762_p10)
}
  0x22   : > { %s2472_s26 = smov 128   ;;  %s2473_s27 = smov 8  }
  0x23   : > { %s2484_s3 = sld [smem:[#allocation15_spill]]  ;;  %s1777_s14 = scalar_lea.vmem %s287_s22, 2048 }
  0x24   : > { %p1778_p13 = scmp.ne.s32.totalorder %s287_s22, %s1777_s14  ;;  %p1785_p3 = scmp.lt.s32.totalorder %s287_s22, %s287_s22 }
  0x25   : > { %p1786_p10 = scmp.lt.s32.totalorder %s1777_s14, %s1777_s14 }
  0x26   : > { %p1780_p0 = pnand %p1778_p13, %p1742_p12 }
  0x27   : > { %p1787_p7 = por %p1786_p10, %p1785_p3 }
  0x28   : > { %p1781_p5 = pneg %p1780_p0 }
  0x29   : > { %1646 = dma.hbm_to_vmem [thread:$0]  (!%p2028_p11), %s2484_s3, 2048, %s271_s19, [#allocation6], %s2472_s26, %s2472_s26, %s2473_s27  }
  0x2a   : > { %p1788_p9 = pnand %p1787_p7, %p1781_p5 }
  0x2c   : > { %1791 = shalt.err (!%p1788_p9)
}
  0x2d   : > { %s2485_s5 = sld [smem:[#allocation16_spill]]  ;;  %s1803_s19 = scalar_lea.vmem %s303_s24, 2048 }
  0x2e   : > { %p1804_p1 = scmp.ne.s32.totalorder %s303_s24, %s1803_s19  ;;  %p1811_p3 = scmp.lt.s32.totalorder %s303_s24, %s303_s24 }
  0x2f   : > { %p1812_p5 = scmp.lt.s32.totalorder %s1803_s19, %s1803_s19 }
  0x30   : > { %p1806_p13 = pnand %p1804_p1, %p1742_p12 }
  0x31   : > { %p1813_p10 = por %p1812_p5, %p1811_p3 }
  0x32   : > { %p1807_p0 = pneg %p1806_p13 }
  0x33   : > { %1649 = dma.hbm_to_vmem [thread:$0]  (!%p2028_p11), %s2485_s5, 2048, %s287_s22, [#allocation6], %s2472_s26, %s2472_s26, %s2473_s27  }
  0x34   : > { %p1814_p7 = pnand %p1813_p10, %p1807_p0 }
  0x36   : > { %1817 = shalt.err (!%p1814_p7)
}
  0x37   : > { %s2486_s7 = sld [smem:[#allocation17_spill]]  ;;  %s2068_s22 = sadd.s32 1, %s1918_s12  }
  0x38   : > { %s31_s20 = ssub.s32 %s1918_s12, %s2068_s22  ;;  %s34_s28 = sadd.s32 1, %s1914_s11 }
  0x39   : > { %p32_p1 = scmp.eq.s32.totalorder %s31_s20, 0  ;;  %p41_p12 = scmp.ne.s32.totalorder %s1914_s11, %s1910_s10 }
  0x3a   : > { %p42_p9 = scmp.eq.s32.totalorder %s1918_s12, 0  ;;  %p1664_p13 = scmp.lt.s32.totalorder %s1918_s12, 2 }
  0x3b   : > { %s2078_s29 = scalar_select %p32_p1, %s1914_s11, %s34_s28  }
  0x3c   : > { %p43_p0 = por %p42_p9, %p41_p12  ;;  %p2082_p3 = por %p239_p2, %p41_p12 }
  0x3d   : > { %1652 = dma.hbm_to_vmem [thread:$0]  (!%p2028_p11), %s2486_s7, 2048, %s303_s24, [#allocation9], %s2472_s26, %s2472_s26, %s2473_s27  }
  0x3e   : > { %s2487_s14 = scalar_select %p2082_p3, 1, 0 }
  0x3f   : > { %s319_s18 = sand.u32 1, %s1914_s11   ;;  %s1329_s21 = sshll.u32 %s1918_s12, 11 }
  0x40   : > { %s1310_s24 = sshll.u32 %s319_s18, 7  ;;  %s2091_s25 = scalar_lea.hbm %s2461_s0, %s1329_s21 }
  0x41   : > { %s323_s20 = scalar_lea.vmem [#allocation2], %s1310_s24  ;;  %p2093_p11 = pnand %p1664_p13, %p43_p0 }
  0x42   : > { %s330_s28 = sshll.u32 %s323_s20, 4  ;;  %s2099_s27 = scalar_lea.sflag [#allocation3], %s319_s18  ;;  %s2097_s28 = int_to_ptr.vmem [resolvable:$true] %s330_s28 }
  0x43   : > { %s1818_s3 = scalar_lea.hbm %s2091_s25, 2048  ;;  %p1820_p5 = pneg %p2093_p11 }
  0x44   : > { %p1819_p2 = scmp.ne.s32.totalorder %s2091_s25, %s1818_s3  ;;  %s1823_s24 = scalar_lea.hbm %s2461_s0, 4096 }
  0x45   : > { %p1824_p1 = scmp.lt.s32.totalorder %s2091_s25, %s2461_s0  ;;  %p1825_p12 = scmp.lt.s32.totalorder %s1823_s24, %s1818_s3 }
  0x46   : > { %p1821_p10 = pnand %p1820_p5, %p1819_p2 }
  0x47   : > { %p1826_p9 = por %p1825_p12, %p1824_p1 }
  0x48   : > { %p1822_p7 = pneg %p1821_p10 }
  0x4a   : > { %p1827_p13 = pnand %p1826_p9, %p1822_p7 }
  0x4c   : > { %1830 = shalt.err (!%p1827_p13)
}
  0x4d   : > { %s1831_s18 = scalar_lea.vmem %s2097_s28, 2048  ;;  %s1925_s5 = smov [#allocation2]  }
  0x4e   : > { %p1832_p0 = scmp.ne.s32.totalorder %s2097_s28, %s1831_s18  ;;  %s1836_s7 = sshll.u32 %s1925_s5, 4  ;;  %s1837_s7 = int_to_ptr.vmem [resolvable:$false] %s1836_s7 }
  0x4f   : > { %s1838_s21 = scalar_lea.vmem %s1837_s7, 4096  ;;  %p1839_p10 = scmp.lt.s32.totalorder %s2097_s28, %s1837_s7 }
  0x50   : > { %p1834_p6 = pnand %p1832_p0, %p1820_p5  ;;  %p1840_p3 = scmp.lt.s32.totalorder %s1838_s21, %s1831_s18 }
  0x52   : > { %p1835_p2 = pneg %p1834_p6  ;;  %p1841_p4 = por %p1840_p3, %p1839_p10 }
  0x54   : > { %p1842_p8 = pnand %p1841_p4, %p1835_p2 }
  0x56   : > { %1845 = shalt.err (!%p1842_p8)
}
  0x57   : > { %s2489_s3 = smov 8   ;;  %s2490_s19 = smov 128  }
  0x58   : > { %1656 = dma.hbm_to_vmem [thread:$0]  (!%p2093_p11), %s2091_s25, 2048, %s2097_s28, %s2099_s27, %s2490_s19, %s2490_s19, %s2489_s3  }
  0x59   : > { %p2491_p6 = scmp.ne.s32.totalorder %s2482_s17, 0 }
  0x5a   : > { %s2126_s5 = sand.u32 (!%p2491_p6), 1, %s1910_s10   ;;  %p2492_p4 = scmp.ne.s32.totalorder (!%p2491_p6), %s2480_s15, 0 }
  0x5b   : > { %342 = sbr.rel (%p2491_p6) target bundleno = 1054 (0x41e), region = 56  ;;  %s1314_s7 = sshll.u32 (!%p2491_p6), %s2126_s5, 7 }
  0x5c   : > { %s345_s24 = scalar_lea.sflag (!%p2491_p6), [#allocation3], %s2126_s5  ;;  %s2132_s26 = scalar_lea.vmem (!%p2491_p6), [#allocation2], %s1314_s7 }
  0x60   : > { %1889 = dma.done.wait (%p2492_p4), %s345_s24, 2048  }
  0x61   : > { %1891 = vsyncadd (%p2492_p4), %s345_s24, 4294965248  ;;  %p2493_p8 = scmp.eq.s32.totalorder %s2000_s13, 0 }
  0x63   : > { %1893 = dma.done.wait (%p2493_p8), [#allocation6], 4096   ;;  %p2494_p3 = pmov %p2493_p8 }
  0x65   : > { %1895 = vsyncadd (%p2494_p3), [#allocation6], 4294963200  ;;  %p2495_p11 = pmov %p2494_p3 }
  0x66   : > { %p2496_p5 = pmov %p2494_p3 }
  0x67   : > { %1897 = dma.done.wait (%p2495_p11), [#allocation9], 2048  }
  0x68   : > { %1899 = vsyncadd (%p2496_p5), [#allocation9], 4294965248  ;;  %v397_v0 = vld [vmem:[%s2132_s26] sm:$0xff]  ;;  %v399_v1 = vld [vmem:[%s2132_s26 + $0x10] sm:$0xff]  ;;  %s2393_s19 = scalar_lea.vmem [#allocation10], %s1314_s7  ;;  %s1330_s7 = sshll.u32 %s2000_s13, 11 }
  0x69   : > { %413 = vadd.xlane.f32.xlu0 %v397_v0  ;;  %417 = vadd.xlane.f32.xlu1 %v399_v1  ;;  %v398_v2 = vld [vmem:[%s2132_s26 + $0x8] sm:$0xff]  ;;  %v400_v3 = vld [vmem:[%s2132_s26 + $0x18] sm:$0xff]  ;;  %v401_v4 = vld [vmem:[%s2132_s26 + $0x20] sm:$0xff]  ;;  %s1202_s24 = sshll.u32 %s2393_s19, 4  ;;  %s2414_s17 = scalar_lea.hbm %s2470_s9, %s1330_s7  ;;  %s2416_s24 = int_to_ptr.vmem [resolvable:$true] %s1202_s24 }
  0x6a   : > { %v402_v5 = vld [vmem:[%s2132_s26 + $0x28] sm:$0xff]  ;;  %v403_v6 = vld [vmem:[%s2132_s26 + $0x30] sm:$0xff]  ;;  %v404_v7 = vld [vmem:[%s2132_s26 + $0x38] sm:$0xff]  ;;  %s1189_s27 = scalar_lea.sflag [#allocation4], %s2126_s5  ;;  %s1846_s13 = scalar_lea.vmem %s2416_s24, 2048 }
  0x6b   : > { %v2155_v8 = vld [vmem:[%s2132_s26 + $0x40] sm:$0xff]  ;;  %v2158_v9 = vld [vmem:[%s2132_s26 + $0x48] sm:$0xff]  ;;  %v2163_v10 = vld [vmem:[%s2132_s26 + $0x50] sm:$0xff]  ;;  %p1847_p7 = scmp.ne.s32.totalorder %s2416_s24, %s1846_s13  ;;  %p2497_p1 = scmp.ne.s32.totalorder %s2487_s14, 0 }
  0x6c   : > { %v2166_v11 = vld [vmem:[%s2132_s26 + $0x58] sm:$0xff]  ;;  %v2171_v12 = vld [vmem:[%s2132_s26 + $0x60] sm:$0xff]  ;;  %v2174_v13 = vld [vmem:[%s2132_s26 + $0x68] sm:$0xff]  ;;  %s1926_s25 = smov [#allocation10]  }
  0x6d   : > { %415 = vadd.xlane.f32.xlu0 %v398_v2  ;;  %419 = vadd.xlane.f32.xlu1 %v400_v3  ;;  %v2179_v14 = vld [vmem:[%s2132_s26 + $0x70] sm:$0xff]  ;;  %v2182_v15 = vld [vmem:[%s2132_s26 + $0x78] sm:$0xff]  ;;  %v649_v50 = vld [vmem:[#allocation5 + $0x68] sm:$0xff]  ;;  %p1848_p12 = pnand %p1847_p7, %p2497_p1  ;;  %s1850_s28 = sshll.u32 %s1926_s25, 4  ;;  %s1851_s28 = int_to_ptr.vmem [resolvable:$false] %s1850_s28 }
  0x6e   : > { %v651_v16 = vld [vmem:[#allocation5 + $0x78] sm:$0xff]  ;;  %v650_v17 = vld [vmem:[#allocation5 + $0x70] sm:$0xff]  ;;  %v648_v54 = vld [vmem:[#allocation5 + $0x60] sm:$0xff]  ;;  %s1852_s23 = scalar_lea.vmem %s1851_s28, 4096  ;;  %p1853_p13 = scmp.lt.s32.totalorder %s2416_s24, %s1851_s28 }
  0x6f   : > { %1427 = vmatprep.subr.mxu0 %v651_v16  ;;  %v647_v63 = vld [vmem:[#allocation5 + $0x58] sm:$0xff]  ;;  %p1849_p9 = pneg %p1848_p12  ;;  %p1854_p0 = scmp.lt.s32.totalorder %s1852_s23, %s1846_s13 }
  0x70   : > { %1428 = vmatpush3.msra.mxu0 %v651_v16 }
  0x71   : > { %421 = vadd.xlane.f32.xlu0 %v401_v4  ;;  %423 = vadd.xlane.f32.xlu1 %v402_v5  ;;  %p1855_p2 = por %p1854_p0, %p1853_p13 }
  0x72   : > { %1429 = vmatprep.subr.mxu0 %v650_v17 }
  0x73   : > { %1430 = vmatpush3.msra.mxu0 %v650_v17  ;;  %v644_v17 = vld [vmem:[#allocation5 + $0x40] sm:$0xff]  ;;  %p1856_p10 = pnand %p1855_p2, %p1849_p9 }
  0x74   : > { %1431 = vmatprep.subr.mxu0 %v649_v50 }
  0x75   : > { %425 = vadd.xlane.f32.xlu0 %v403_v6  ;;  %427 = vadd.xlane.f32.xlu1 %v404_v7 }
  0x76   : > { %1432 = vmatpush3.msra.mxu0 %v649_v50  ;;  %v825_v50 = vld [vmem:[#allocation7 + $0x28] sm:$0xff] }
  0x77   : > { %1433 = vmatprep.subr.mxu0 %v648_v54 }
  0x78   : > { %1434 = vmatpush3.msra.mxu0 %v648_v54 }
  0x79   : > { %429 = vadd.xlane.f32.xlu0 %v2155_v8  ;;  %431 = vadd.xlane.f32.xlu1 %v2158_v9 }
  0x7a   : > { %1435 = vmatprep.subr.mxu0 %v647_v63 }
  0x7b   : > { %1436 = vmatpush3.msra.mxu0 %v647_v63 }
  0x7d   : > { %433 = vadd.xlane.f32.xlu0 %v2163_v10  ;;  %435 = vadd.xlane.f32.xlu1 %v2166_v11 }
  0x81   : > { %437 = vadd.xlane.f32.xlu0 %v2171_v12  ;;  %439 = vadd.xlane.f32.xlu1 %v2174_v13 }
  0x85   : > { %441 = vadd.xlane.f32.xlu0 %v2179_v14  ;;  %443 = vadd.xlane.f32.xlu1 %v2182_v15 }
  0xf2   : > { %v414_v18 = vpop.xlane.xlu0 %413  ;;  %v418_v19 = vpop.xlane.xlu1 %417 }
  0xf3   : > { %v446_v20 = vmul.f32 0.0078125, %v414_v18  ;;  %v448_v21 = vmul.f32 0.0078125, %v418_v19 }
  0xf5   : > { %v2186_v22 = vsub.f32 %v397_v0, %v446_v20  ;;  %v2188_v23 = vsub.f32 %v399_v1, %v448_v21 }
  0xf6   : > { %v416_v24 = vpop.xlane.xlu0 %415  ;;  %v420_v25 = vpop.xlane.xlu1 %419 }
  0xf7   : > { %v447_v26 = vmul.f32 0.0078125, %v416_v24  ;;  %v478_v27 = vmul.f32 %v2186_v22, %v2186_v22  ;;  %v449_v28 = vmul.f32 0.0078125, %v420_v25  ;;  %v480_v31 = vmul.f32 %v2188_v23, %v2188_v23 }
  0xf9   : > { %v2192_v29 = vsub.f32 %v398_v2, %v447_v26  ;;  %494 = vadd.xlane.f32.xlu0 %v478_v27  ;;  %v2194_v30 = vsub.f32 %v400_v3, %v449_v28  ;;  %v646_v3 = vld [vmem:[#allocation5 + $0x50] sm:$0xff] }
  0xfa   : > { %v422_v32 = vpop.xlane.xlu0 %421  ;;  %v424_v33 = vpop.xlane.xlu1 %423  ;;  %1437 = vmatprep.subr.mxu0 %v646_v3  ;;  %v642_v28 = vld [vmem:[#allocation5 + $0x30] sm:$0xff] }
  0xfb   : > { %v450_v34 = vmul.f32 0.0078125, %v422_v32  ;;  %v479_v35 = vmul.f32 %v2192_v29, %v2192_v29  ;;  %v451_v36 = vmul.f32 0.0078125, %v424_v33  ;;  %v481_v39 = vmul.f32 %v2194_v30, %v2194_v30  ;;  %1438 = vmatpush3.msra.mxu0 %v646_v3  ;;  %v639_v32 = vld [vmem:[#allocation5 + $0x18] sm:$0xff]  ;;  %v638_v33 = vld [vmem:[#allocation5 + $0x10] sm:$0xff] }
  0xfd   : > { %v2200_v37 = vsub.f32 %v401_v4, %v450_v34  ;;  %498 = vadd.xlane.f32.xlu0 %v480_v31  ;;  %496 = vadd.xlane.f32.xlu1 %v479_v35  ;;  %v2202_v38 = vsub.f32 %v402_v5, %v451_v36  ;;  %v641_v31 = vld [vmem:[#allocation5 + $0x28] sm:$0xff]  ;;  %v636_v35 = vld [vmem:[#allocation5] sm:$0xff]  ;;  %v835_v36 = vld [vmem:[#allocation7 + $0x78] sm:$0xff] }
  0xfe   : > { %v426_v40 = vpop.xlane.xlu0 %425  ;;  %v428_v41 = vpop.xlane.xlu1 %427  ;;  %v637_v34 = vld [vmem:[#allocation5 + $0x8] sm:$0xff]  ;;  %1483 = vmatprep.subr.mxu1 %v835_v36 }
  0xff   : > { %v452_v42 = vmul.f32 0.0078125, %v426_v40  ;;  %v482_v43 = vmul.f32 %v2200_v37, %v2200_v37  ;;  %v453_v44 = vmul.f32 0.0078125, %v428_v41  ;;  %v483_v47 = vmul.f32 %v2202_v38, %v2202_v38  ;;  %1484 = vmatpush3.msra.mxu1 %v835_v36  ;;  %v833_v40 = vld [vmem:[#allocation7 + $0x68] sm:$0xff]  ;;  %v832_v41 = vld [vmem:[#allocation7 + $0x60] sm:$0xff] }
 0x101   : > { %v2208_v45 = vsub.f32 %v403_v6, %v452_v42  ;;  %500 = vadd.xlane.f32.xlu1 %v481_v39  ;;  %502 = vadd.xlane.f32.xlu0 %v482_v43  ;;  %v2210_v46 = vsub.f32 %v404_v7, %v453_v44  ;;  %v834_v39 = vld [vmem:[#allocation7 + $0x70] sm:$0xff]  ;;  %v831_v42 = vld [vmem:[#allocation7 + $0x58] sm:$0xff]  ;;  %v829_v44 = vld [vmem:[#allocation7 + $0x48] sm:$0xff] }
 0x102   : > { %v430_v48 = vpop.xlane.xlu0 %429  ;;  %v432_v49 = vpop.xlane.xlu1 %431  ;;  %1485 = vmatprep.subr.mxu1 %v834_v39  ;;  %v830_v43 = vld [vmem:[#allocation7 + $0x50] sm:$0xff] }
 0x103   : > { %v454_v51 = vmul.f32 0.0078125, %v430_v48  ;;  %v484_v52 = vmul.f32 %v2208_v45, %v2208_v45  ;;  %v455_v53 = vmul.f32 0.0078125, %v432_v49  ;;  %v485_v57 = vmul.f32 %v2210_v46, %v2210_v46  ;;  %1486 = vmatpush3.msra.mxu1 %v834_v39  ;;  %v827_v48 = vld [vmem:[#allocation7 + $0x38] sm:$0xff]  ;;  %v826_v49 = vld [vmem:[#allocation7 + $0x30] sm:$0xff] }
 0x104   : > { %1487 = vmatprep.subr.mxu1 %v833_v40 }
 0x105   : > { %v2217_v55 = vsub.f32 %v2155_v8, %v454_v51  ;;  %504 = vadd.xlane.f32.xlu1 %v483_v47  ;;  %506 = vadd.xlane.f32.xlu0 %v484_v52  ;;  %v2220_v56 = vsub.f32 %v2158_v9, %v455_v53  ;;  %v645_v9 = vld [vmem:[#allocation5 + $0x48] sm:$0xff]  ;;  %v828_v47 = vld [vmem:[#allocation7 + $0x40] sm:$0xff] }
 0x106   : > { %v434_v58 = vpop.xlane.xlu0 %433  ;;  %v436_v59 = vpop.xlane.xlu1 %435  ;;  %1439 = vmatprep.subr.mxu0 %v645_v9  ;;  %1488 = vmatpush3.msra.mxu1 %v833_v40  ;;  %v824_v51 = vld [vmem:[#allocation7 + $0x20] sm:$0xff] }
 0x107   : > { %v456_v60 = vmul.f32 0.0078125, %v434_v58  ;;  %v486_v61 = vmul.f32 %v2217_v55, %v2217_v55  ;;  %v457_v62 = vmul.f32 0.0078125, %v436_v59  ;;  %v487_v2 = vmul.f32 %v2220_v56, %v2220_v56  ;;  %1440 = vmatpush3.msra.mxu0 %v645_v9  ;;  %1489 = vmatprep.subr.mxu1 %v832_v41 }
 0x108   : > { %1441 = vmatprep.subr.mxu0 %v644_v17  ;;  %1490 = vmatpush3.msra.mxu1 %v832_v41 }
 0x109   : > { %v2227_v0 = vsub.f32 %v2163_v10, %v456_v60  ;;  %508 = vadd.xlane.f32.xlu1 %v485_v57  ;;  %510 = vadd.xlane.f32.xlu0 %v486_v61  ;;  %v2230_v1 = vsub.f32 %v2166_v11, %v457_v62 }
 0x10a   : > { %v438_v4 = vpop.xlane.xlu0 %437  ;;  %v440_v5 = vpop.xlane.xlu1 %439  ;;  %1442 = vmatpush3.msra.mxu0 %v644_v17  ;;  %1491 = vmatprep.subr.mxu1 %v831_v42 }
 0x10b   : > { %v458_v6 = vmul.f32 0.0078125, %v438_v4  ;;  %v488_v7 = vmul.f32 %v2227_v0, %v2227_v0  ;;  %v459_v8 = vmul.f32 0.0078125, %v440_v5  ;;  %v489_v16 = vmul.f32 %v2230_v1, %v2230_v1  ;;  %1492 = vmatpush3.msra.mxu1 %v831_v42 }
 0x10c   : > { %1493 = vmatprep.subr.mxu1 %v830_v43 }
 0x10d   : > { %v2237_v10 = vsub.f32 %v2171_v12, %v458_v6  ;;  %512 = vadd.xlane.f32.xlu1 %v487_v2  ;;  %514 = vadd.xlane.f32.xlu0 %v488_v7  ;;  %v2240_v11 = vsub.f32 %v2174_v13, %v459_v8  ;;  %v643_v12 = vld [vmem:[#allocation5 + $0x38] sm:$0xff] }
 0x10e   : > { %v442_v18 = vpop.xlane.xlu0 %441  ;;  %v444_v19 = vpop.xlane.xlu1 %443  ;;  %1443 = vmatprep.subr.mxu0 %v643_v12  ;;  %1494 = vmatpush3.msra.mxu1 %v830_v43 }
 0x10f   : > { %v460_v20 = vmul.f32 0.0078125, %v442_v18  ;;  %v490_v21 = vmul.f32 %v2237_v10, %v2237_v10  ;;  %v461_v24 = vmul.f32 0.0078125, %v444_v19  ;;  %v491_v26 = vmul.f32 %v2240_v11, %v2240_v11  ;;  %1444 = vmatpush3.msra.mxu0 %v643_v12  ;;  %1495 = vmatprep.subr.mxu1 %v829_v44 }
 0x110   : > { %1445 = vmatprep.subr.mxu0 %v642_v28  ;;  %1496 = vmatpush3.msra.mxu1 %v829_v44 }
 0x111   : > { %v2247_v25 = vsub.f32 %v2179_v14, %v460_v20  ;;  %516 = vadd.xlane.f32.xlu1 %v489_v16  ;;  %518 = vadd.xlane.f32.xlu0 %v490_v21  ;;  %v2250_v13 = vsub.f32 %v2182_v15, %v461_v24  ;;  %v640_v15 = vld [vmem:[#allocation5 + $0x20] sm:$0xff] }
 0x112   : > { %1446 = vmatpush3.msra.mxu0 %v642_v28  ;;  %1497 = vmatprep.subr.mxu1 %v828_v47 }
 0x113   : > { %v492_v27 = vmul.f32 %v2247_v25, %v2247_v25  ;;  %v493_v14 = vmul.f32 %v2250_v13, %v2250_v13  ;;  %1447 = vmatprep.subr.mxu0 %v641_v31  ;;  %1498 = vmatpush3.msra.mxu1 %v828_v47 }
 0x114   : > { %1448 = vmatpush3.msra.mxu0 %v641_v31  ;;  %1499 = vmatprep.subr.mxu1 %v827_v48 }
 0x115   : > { %520 = vadd.xlane.f32.xlu1 %v491_v26  ;;  %522 = vadd.xlane.f32.xlu0 %v492_v27  ;;  %v2261_v26 = vld [vmem:[%s2462_s1] ss:$0 sm:$0xff] }
 0x116   : > { %1449 = vmatprep.subr.mxu0 %v640_v15  ;;  %1500 = vmatpush3.msra.mxu1 %v827_v48 }
 0x117   : > { %1450 = vmatpush3.msra.mxu0 %v640_v15  ;;  %1501 = vmatprep.subr.mxu1 %v826_v49 }
 0x118   : > { %1451 = vmatprep.subr.mxu0 %v639_v32  ;;  %1502 = vmatpush3.msra.mxu1 %v826_v49 }
 0x119   : > { %524 = vadd.xlane.f32.xlu1 %v493_v14  ;;  %1452 = vmatpush3.msra.mxu0 %v639_v32  ;;  %v2267_v32 = vld [vmem:[%s2463_s2] ss:$0 sm:$0xff] }
 0x11a   : > { %1453 = vmatprep.subr.mxu0 %v638_v33  ;;  %1503 = vmatprep.subr.mxu1 %v825_v50 }
 0x11b   : > { %1454 = vmatpush3.msra.mxu0 %v638_v33  ;;  %1504 = vmatpush3.msra.mxu1 %v825_v50 }
 0x11c   : > { %1455 = vmatprep.subr.mxu0 %v637_v34  ;;  %1505 = vmatprep.subr.mxu1 %v824_v51 }
 0x11d   : > { %1456 = vmatpush3.msra.mxu0 %v637_v34  ;;  %1506 = vmatpush3.msra.mxu1 %v824_v51 }
 0x11e   : > { %1457 = vmatprep.subr.mxu0 %v636_v35 }
 0x11f   : > { %1458 = vmatpush3.msra.mxu0 %v636_v35 }
 0x182   : > { %v495_v52 = vpop.xlane.xlu0 %494 }
 0x183   : > { %v526_v53 = vmul.f32 0.0078125, %v495_v52 }
 0x185   : > { %v542_v54 = vadd.f32 0.0001, %v526_v53 }
 0x186   : > { %v497_v57 = vpop.xlane.xlu1 %496  ;;  %v499_v58 = vpop.xlane.xlu0 %498 }
 0x187   : > { %1708 = vrsqrt.f32 %v542_v54  ;;  %v527_v59 = vmul.f32 0.0078125, %v497_v57  ;;  %v528_v60 = vmul.f32 0.0078125, %v499_v58 }
 0x189   : > { %v543_v61 = vadd.f32 0.0001, %v527_v59  ;;  %v544_v62 = vadd.f32 0.0001, %v528_v60 }
 0x18a   : > { %v501_v63 = vpop.xlane.xlu1 %500  ;;  %v503_v2 = vpop.xlane.xlu0 %502 }
 0x18b   : > { %1710 = vrsqrt.f32 %v543_v61  ;;  %v529_v3 = vmul.f32 0.0078125, %v501_v63  ;;  %v530_v4 = vmul.f32 0.0078125, %v503_v2 }
 0x18c   : > { %1712 = vrsqrt.f32 %v544_v62 }
 0x18d   : > { %v545_v5 = vadd.f32 0.0001, %v529_v3  ;;  %v546_v6 = vadd.f32 0.0001, %v530_v4 }
 0x18e   : > { %v505_v7 = vpop.xlane.xlu1 %504  ;;  %v507_v8 = vpop.xlane.xlu0 %506 }
 0x18f   : > { %1714 = vrsqrt.f32 %v545_v5  ;;  %v531_v9 = vmul.f32 0.0078125, %v505_v7  ;;  %v532_v16 = vmul.f32 0.0078125, %v507_v8 }
 0x190   : > { %1716 = vrsqrt.f32 %v546_v6 }
 0x191   : > { %v547_v17 = vadd.f32 0.0001, %v531_v9  ;;  %v548_v18 = vadd.f32 0.0001, %v532_v16 }
 0x192   : > { %v509_v19 = vpop.xlane.xlu1 %508  ;;  %v511_v20 = vpop.xlane.xlu0 %510 }
 0x193   : > { %1718 = vrsqrt.f32 %v547_v17  ;;  %v533_v21 = vmul.f32 0.0078125, %v509_v19  ;;  %v534_v24 = vmul.f32 0.0078125, %v511_v20 }
 0x194   : > { %v1709_v12 = vpop.eup %1708  ;;  %1720 = vrsqrt.f32 %v548_v18 }
 0x195   : > { %v549_v27 = vadd.f32 0.0001, %v533_v21  ;;  %v550_v28 = vadd.f32 0.0001, %v534_v24  ;;  %v574_v14 = vmul.f32 %v1709_v12, %v2186_v22 }
 0x196   : > { %v513_v31 = vpop.xlane.xlu1 %512  ;;  %v515_v15 = vpop.xlane.xlu0 %514 }
 0x197   : > { %1722 = vrsqrt.f32 %v549_v27  ;;  %v535_v33 = vmul.f32 0.0078125, %v513_v31  ;;  %v536_v34 = vmul.f32 0.0078125, %v515_v15  ;;  %v597_v35 = vmul.f32 %v2261_v26, %v574_v14 }
 0x198   : > { %v1711_v36 = vpop.eup %1710  ;;  %1724 = vrsqrt.f32 %v550_v28 }
 0x199   : > { %v1713_v39 = vpop.eup %1712  ;;  %v551_v40 = vadd.f32 0.0001, %v535_v33  ;;  %v552_v41 = vadd.f32 0.0001, %v536_v34  ;;  %v620_v42 = vadd.f32 %v2267_v32, %v597_v35  ;;  %v575_v22 = vmul.f32 %v1711_v36, %v2192_v29 }
 0x19a   : > { %v517_v43 = vpop.xlane.xlu1 %516  ;;  %v519_v44 = vpop.xlane.xlu0 %518  ;;  %v576_v47 = vmul.f32 %v1713_v39, %v2188_v23 }
 0x19b   : > { %1726 = vrsqrt.f32 %v551_v40  ;;  %v537_v48 = vmul.f32 0.0078125, %v517_v43  ;;  %v538_v49 = vmul.f32 0.0078125, %v519_v44  ;;  %1459 = vmatprep.mubr.f32.mxu0 %v620_v42  ;;  %v598_v50 = vmul.f32 %v2261_v26, %v575_v22 }
 0x19c   : > { %v1715_v51 = vpop.eup %1714  ;;  %1728 = vrsqrt.f32 %v552_v41  ;;  %v599_v52 = vmul.f32 %v2261_v26, %v576_v47 }
 0x19d   : > { %v1717_v53 = vpop.eup %1716  ;;  %v553_v54 = vadd.f32 0.0001, %v537_v48  ;;  %v554_v57 = vadd.f32 0.0001, %v538_v49  ;;  %v621_v58 = vadd.f32 %v2267_v32, %v598_v50  ;;  %v577_v29 = vmul.f32 %v1715_v51, %v2194_v30 }
 0x19e   : > { %v521_v59 = vpop.xlane.xlu1 %520  ;;  %v523_v60 = vpop.xlane.xlu0 %522  ;;  %v622_v23 = vadd.f32 %v2267_v32, %v599_v52  ;;  %v578_v61 = vmul.f32 %v1717_v53, %v2200_v37 }
 0x19f   : > { %1730 = vrsqrt.f32 %v553_v54  ;;  %v539_v62 = vmul.f32 0.0078125, %v521_v59  ;;  %v540_v63 = vmul.f32 0.0078125, %v523_v60  ;;  %1460 = vmatmul.mubr.f32.vlgmr.msra.gmra.mxu0 %v621_v58  ;;  %v600_v2 = vmul.f32 %v2261_v26, %v577_v29  ;;  %v822_v29 = vld [vmem:[#allocation7 + $0x10] sm:$0xff]  ;;  %v821_v59 = vld [vmem:[#allocation7 + $0x8] sm:$0xff]  ;;  %v820_v60 = vld [vmem:[#allocation7] sm:$0xff] }
 0x1a0   : > { %v1719_v3 = vpop.eup %1718  ;;  %1732 = vrsqrt.f32 %v554_v57  ;;  %1462 = vmatprep.mubr.f32.mxu0 %v622_v23  ;;  %v601_v4 = vmul.f32 %v2261_v26, %v578_v61  ;;  %v1018_v23 = vld [vmem:[#allocation8 + $0x70] sm:$0xff]  ;;  %v2316_v61 = vld [vmem:[#allocation8 + $0x58] sm:$0xff] }
 0x1a1   : > { %v1721_v5 = vpop.eup %1720  ;;  %v555_v6 = vadd.f32 0.0001, %v539_v62  ;;  %v556_v30 = vadd.f32 0.0001, %v540_v63  ;;  %v623_v7 = vadd.f32 %v2267_v32, %v600_v2  ;;  %v579_v8 = vmul.f32 %v1719_v3, %v2202_v38  ;;  %v2318_v62 = vld [vmem:[#allocation8 + $0x50] sm:$0xff]  ;;  %v2322_v63 = vld [vmem:[#allocation8 + $0x48] sm:$0xff] }
 0x1a2   : > { %v525_v9 = vpop.xlane.xlu1 %524  ;;  %v624_v37 = vadd.f32 %v2267_v32, %v601_v4  ;;  %v580_v16 = vmul.f32 %v1721_v5, %v2208_v45  ;;  %v2326_v2 = vld [vmem:[#allocation8 + $0x40] sm:$0xff]  ;;  %v2330_v3 = vld [vmem:[#allocation8 + $0x38] sm:$0xff]  ;;  %v2334_v4 = vld [vmem:[#allocation8 + $0x30] sm:$0xff] }
 0x1a3   : > { %1734 = vrsqrt.f32 %v555_v6  ;;  %v541_v17 = vmul.f32 0.0078125, %v525_v9  ;;  %1463 = vmatmul.mubr.f32.gmra.mxu0 %v623_v7  ;;  %v602_v18 = vmul.f32 %v2261_v26, %v579_v8  ;;  %v2338_v5 = vld [vmem:[#allocation8 + $0x28] sm:$0xff]  ;;  %v2342_v6 = vld [vmem:[#allocation8 + $0x20] sm:$0xff] }
 0x1a4   : > { %v1723_v19 = vpop.eup %1722  ;;  %1736 = vrsqrt.f32 %v556_v30  ;;  %1465 = vmatprep.mubr.f32.mxu0 %v624_v37  ;;  %v603_v20 = vmul.f32 %v2261_v26, %v580_v16  ;;  %v2351_v30 = vld [vmem:[%s2465_s4] ss:$0 sm:$0xff] }
 0x1a5   : > { %v1725_v21 = vpop.eup %1724  ;;  %v557_v24 = vadd.f32 0.0001, %v541_v17  ;;  %v625_v12 = vadd.f32 %v2267_v32, %v602_v18  ;;  %v581_v38 = vmul.f32 %v1723_v19, %v2210_v46 }
 0x1a6   : > { %v626_v27 = vadd.f32 %v2267_v32, %v603_v20  ;;  %v582_v45 = vmul.f32 %v1725_v21, %v2217_v55 }
 0x1a7   : > { %1738 = vrsqrt.f32 %v557_v24  ;;  %1466 = vmatmul.mubr.f32.gmra.mxu0 %v625_v12  ;;  %v604_v28 = vmul.f32 %v2261_v26, %v581_v38 }
 0x1a8   : > { %v1727_v14 = vpop.eup %1726  ;;  %1468 = vmatprep.mubr.f32.mxu0 %v626_v27  ;;  %v605_v31 = vmul.f32 %v2261_v26, %v582_v45 }
 0x1a9   : > { %v1729_v15 = vpop.eup %1728  ;;  %v627_v33 = vadd.f32 %v2267_v32, %v604_v28  ;;  %v583_v34 = vmul.f32 %v1727_v14, %v2220_v56 }
 0x1aa   : > { %v628_v35 = vadd.f32 %v2267_v32, %v605_v31  ;;  %v584_v46 = vmul.f32 %v1729_v15, %v2227_v0 }
 0x1ab   : > { %1469 = vmatmul.mubr.f32.gmra.mxu0 %v627_v33  ;;  %v606_v55 = vmul.f32 %v2261_v26, %v583_v34 }
 0x1ac   : > { %v1731_v36 = vpop.eup %1730  ;;  %1471 = vmatprep.mubr.f32.mxu0 %v628_v35  ;;  %v607_v39 = vmul.f32 %v2261_v26, %v584_v46 }
 0x1ad   : > { %v1733_v40 = vpop.eup %1732  ;;  %v629_v41 = vadd.f32 %v2267_v32, %v606_v55  ;;  %v585_v42 = vmul.f32 %v1731_v36, %v2230_v1 }
 0x1ae   : > { %v630_v22 = vadd.f32 %v2267_v32, %v607_v39  ;;  %v586_v56 = vmul.f32 %v1733_v40, %v2237_v10 }
 0x1af   : > { %1472 = vmatmul.mubr.f32.gmra.mxu0 %v629_v41  ;;  %v608_v43 = vmul.f32 %v2261_v26, %v585_v42 }
 0x1b0   : > { %v1735_v0 = vpop.eup %1734  ;;  %1474 = vmatprep.mubr.f32.mxu0 %v630_v22  ;;  %v609_v44 = vmul.f32 %v2261_v26, %v586_v56 }
 0x1b1   : > { %v1737_v47 = vpop.eup %1736  ;;  %v631_v48 = vadd.f32 %v2267_v32, %v608_v43  ;;  %v587_v49 = vmul.f32 %v1735_v0, %v2240_v11 }
 0x1b2   : > { %v632_v50 = vadd.f32 %v2267_v32, %v609_v44  ;;  %v588_v1 = vmul.f32 %v1737_v47, %v2247_v25  ;;  %v823_v25 = vld [vmem:[#allocation7 + $0x18] sm:$0xff] }
 0x1b3   : > { %1475 = vmatmul.mubr.f32.gmra.mxu0 %v631_v48  ;;  %v610_v51 = vmul.f32 %v2261_v26, %v587_v49  ;;  %1507 = vmatprep.subr.mxu1 %v823_v25 }
 0x1b4   : > { %v1739_v10 = vpop.eup %1738  ;;  %1477 = vmatprep.mubr.f32.mxu0 %v632_v50  ;;  %v611_v52 = vmul.f32 %v2261_v26, %v588_v1  ;;  %1508 = vmatpush3.msra.mxu1 %v823_v25 }
 0x1b5   : > { %v633_v53 = vadd.f32 %v2267_v32, %v610_v51  ;;  %v589_v54 = vmul.f32 %v1739_v10, %v2250_v13  ;;  %1509 = vmatprep.subr.mxu1 %v822_v29  ;;  %v1019_v13 = vld [vmem:[#allocation8 + $0x78] sm:$0xff] }
 0x1b6   : > { %v634_v57 = vadd.f32 %v2267_v32, %v611_v52  ;;  %1510 = vmatpush3.msra.mxu1 %v822_v29  ;;  %1539 = vmatprep.subr.mxu0 %v1019_v13  ;;  %v1007_v29 = vld [vmem:[#allocation8 + $0x18] sm:$0xff] }
 0x1b7   : > { %1478 = vmatmul.mubr.f32.gmra.mxu0 %v633_v53  ;;  %v612_v11 = vmul.f32 %v2261_v26, %v589_v54  ;;  %1511 = vmatprep.subr.mxu1 %v821_v59  ;;  %v1017_v26 = vld [vmem:[#allocation8 + $0x68] sm:$0xff] }
 0x1b8   : > { %1480 = vmatprep.mubr.f32.mxu0 %v634_v57  ;;  %1512 = vmatpush3.msra.mxu1 %v821_v59  ;;  %v1006_v59 = vld [vmem:[#allocation8 + $0x10] sm:$0xff] }
 0x1b9   : > { %v635_v58 = vadd.f32 %v2267_v32, %v612_v11  ;;  %1513 = vmatprep.subr.mxu1 %v820_v60  ;;  %1540 = vmatpush3.msra.mxu0 %v1019_v13  ;;  %v1016_v32 = vld [vmem:[#allocation8 + $0x60] sm:$0xff] }
 0x1ba   : > { %1514 = vmatpush3.msra.mxu1 %v820_v60  ;;  %1541 = vmatprep.subr.mxu0 %v1018_v23  ;;  %v1005_v60 = vld [vmem:[#allocation8 + $0x8] sm:$0xff] }
 0x1bb   : > { %1481 = vmatmul.mubr.f32.gmra.mxu0 %v635_v58  ;;  %1595 = vmatprep.subr.mxu1 %v1019_v13 }
 0x1bc   : > { %1542 = vmatpush3.msra.mxu0 %v1018_v23 }
 0x1bd   : > { %1543 = vmatprep.subr.mxu0 %v1017_v26 }
 0x1be   : > { %1544 = vmatpush3.msra.mxu0 %v1017_v26 }
 0x1bf   : > { %1545 = vmatprep.subr.mxu0 %v1016_v32 }
 0x1c0   : > { %1546 = vmatpush3.msra.mxu0 %v1016_v32 }
 0x1c1   : > { %1547 = vmatprep.subr.mxu0 %v2316_v61 }
 0x1c2   : > { %1548 = vmatpush3.msra.mxu0 %v2316_v61 }
 0x1c3   : > { %1549 = vmatprep.subr.mxu0 %v2318_v62 }
 0x1c4   : > { %1550 = vmatpush3.msra.mxu0 %v2318_v62 }
 0x1c5   : > { %1551 = vmatprep.subr.mxu0 %v2322_v63 }
 0x1c6   : > { %1552 = vmatpush3.msra.mxu0 %v2322_v63 }
 0x1c7   : > { %1553 = vmatprep.subr.mxu0 %v2326_v2 }
 0x1c8   : > { %1554 = vmatpush3.msra.mxu0 %v2326_v2 }
 0x1c9   : > { %1555 = vmatprep.subr.mxu0 %v2330_v3 }
 0x1ca   : > { %1556 = vmatpush3.msra.mxu0 %v2330_v3 }
 0x1cb   : > { %1557 = vmatprep.subr.mxu0 %v2334_v4 }
 0x1cc   : > { %1558 = vmatpush3.msra.mxu0 %v2334_v4 }
 0x1cd   : > { %1559 = vmatprep.subr.mxu0 %v2338_v5 }
 0x1ce   : > { %1560 = vmatpush3.msra.mxu0 %v2338_v5 }
 0x1cf   : > { %1561 = vmatprep.subr.mxu0 %v2342_v6 }
 0x1d0   : > { %1562 = vmatpush3.msra.mxu0 %v2342_v6 }
 0x1d1   : > { %1563 = vmatprep.subr.mxu0 %v1007_v29 }
 0x1d2   : > { %1564 = vmatpush3.msra.mxu0 %v1007_v29 }
 0x1d3   : > { %1565 = vmatprep.subr.mxu0 %v1006_v59 }
 0x1d4   : > { %1566 = vmatpush3.msra.mxu0 %v1006_v59 }
 0x1d5   : > { %1567 = vmatprep.subr.mxu0 %v1005_v60 }
 0x1d6   : > { %1568 = vmatpush3.msra.mxu0 %v1005_v60 }
 0x25f   : > { %v1461_v7 = vpop.f32.mrf.mxu0 }
 0x260   : > { %v731_v8 = vadd.f32 %v1461_v7, %v2351_v30 }
 0x261   : > { %v725_v9 = vpop.f32.mrf.mxu0 }
 0x262   : > { %v726_v37 = vadd.f32 %v2351_v30, %v725_v9  ;;  %v805_v18 = vmax.f32 %v731_v8, 0.0 }
 0x263   : > { %v1464_v16 = vpop.f32.mrf.mxu0 }
 0x264   : > { %v804_v17 = vmax.f32 %v726_v37, 0.0  ;;  %v741_v19 = vadd.f32 %v1464_v16, %v2351_v30 }
 0x265   : > { %v735_v20 = vpop.f32.mrf.mxu0 }
 0x266   : > { %v736_v21 = vadd.f32 %v2351_v30, %v735_v20  ;;  %1515 = vmatprep.mubr.f32.mxu1 %v804_v17  ;;  %v807_v38 = vmax.f32 %v741_v19, 0.0 }
 0x267   : > { %v1467_v24 = vpop.f32.mrf.mxu0  ;;  %1516 = vmatmul.mubr.f32.vlgmr.msra.gmra.mxu1 %v805_v18 }
 0x268   : > { %v806_v12 = vmax.f32 %v736_v21, 0.0  ;;  %1611 = vmatpush3.msra.mxu1 %v1019_v13  ;;  %v751_v27 = vadd.f32 %v1467_v24, %v2351_v30  ;;  %v1004_v13 = vld [vmem:[#allocation8] sm:$0xff] }
 0x269   : > { %v745_v45 = vpop.f32.mrf.mxu0  ;;  %1596 = vmatprep.subr.mxu1 %v1018_v23  ;;  %1569 = vmatprep.subr.mxu0 %v1004_v13 }
 0x26a   : > { %v746_v28 = vadd.f32 %v2351_v30, %v745_v45  ;;  %1518 = vmatprep.mubr.f32.mxu1 %v806_v12  ;;  %1612 = vmatpush3.msra.mxu1 %v1018_v23  ;;  %v809_v15 = vmax.f32 %v751_v27, 0.0  ;;  %v1322_v23 = vld [vmem:[%s2467_s6] ss:$0 sm:$0xff] }
 0x26b   : > { %v1470_v14 = vpop.f32.mrf.mxu0  ;;  %1519 = vmatmul.mubr.f32.gmra.mxu1 %v807_v38  ;;  %1597 = vmatprep.subr.mxu1 %v1017_v26 }
 0x26c   : > { %v808_v31 = vmax.f32 %v746_v28, 0.0  ;;  %1613 = vmatpush3.msra.mxu1 %v1017_v26  ;;  %v761_v33 = vadd.f32 %v1470_v14, %v2351_v30  ;;  %1570 = vmatpush3.msra.mxu0 %v1004_v13 }
 0x26d   : > { %v755_v34 = vpop.f32.mrf.mxu0  ;;  %1598 = vmatprep.subr.mxu1 %v1016_v32 }
 0x26e   : > { %v756_v35 = vadd.f32 %v2351_v30, %v755_v34  ;;  %1521 = vmatprep.mubr.f32.mxu1 %v808_v31  ;;  %1614 = vmatpush3.msra.mxu1 %v1016_v32  ;;  %v811_v36 = vmax.f32 %v761_v33, 0.0 }
 0x26f   : > { %v1473_v46 = vpop.f32.mrf.mxu0  ;;  %1522 = vmatmul.mubr.f32.gmra.mxu1 %v809_v15  ;;  %1599 = vmatprep.subr.mxu1 %v2316_v61 }
 0x270   : > { %v810_v55 = vmax.f32 %v756_v35, 0.0  ;;  %1615 = vmatpush3.msra.mxu1 %v2316_v61  ;;  %v771_v39 = vadd.f32 %v1473_v46, %v2351_v30 }
 0x271   : > { %v765_v40 = vpop.f32.mrf.mxu0  ;;  %1600 = vmatprep.subr.mxu1 %v2318_v62 }
 0x272   : > { %v766_v41 = vadd.f32 %v2351_v30, %v765_v40  ;;  %1524 = vmatprep.mubr.f32.mxu1 %v810_v55  ;;  %1616 = vmatpush3.msra.mxu1 %v2318_v62  ;;  %v813_v56 = vmax.f32 %v771_v39, 0.0 }
 0x273   : > { %v1476_v42 = vpop.f32.mrf.mxu0  ;;  %1525 = vmatmul.mubr.f32.gmra.mxu1 %v811_v36  ;;  %1601 = vmatprep.subr.mxu1 %v2322_v63 }
 0x274   : > { %v812_v22 = vmax.f32 %v766_v41, 0.0  ;;  %1617 = vmatpush3.msra.mxu1 %v2322_v63  ;;  %v781_v43 = vadd.f32 %v1476_v42, %v2351_v30 }
 0x275   : > { %v775_v0 = vpop.f32.mrf.mxu0  ;;  %1602 = vmatprep.subr.mxu1 %v2326_v2 }
 0x276   : > { %v776_v44 = vadd.f32 %v2351_v30, %v775_v0  ;;  %1527 = vmatprep.mubr.f32.mxu1 %v812_v22  ;;  %1618 = vmatpush3.msra.mxu1 %v2326_v2  ;;  %v815_v49 = vmax.f32 %v781_v43, 0.0 }
 0x277   : > { %v1479_v47 = vpop.f32.mrf.mxu0  ;;  %1528 = vmatmul.mubr.f32.gmra.mxu1 %v813_v56  ;;  %1603 = vmatprep.subr.mxu1 %v2330_v3 }
 0x278   : > { %v814_v48 = vmax.f32 %v776_v44, 0.0  ;;  %1619 = vmatpush3.msra.mxu1 %v2330_v3  ;;  %v791_v50 = vadd.f32 %v1479_v47, %v2351_v30 }
 0x279   : > { %v785_v1 = vpop.f32.mrf.mxu0  ;;  %1604 = vmatprep.subr.mxu1 %v2334_v4 }
 0x27a   : > { %v786_v51 = vadd.f32 %v2351_v30, %v785_v1  ;;  %1530 = vmatprep.mubr.f32.mxu1 %v814_v48  ;;  %1620 = vmatpush3.msra.mxu1 %v2334_v4  ;;  %v817_v53 = vmax.f32 %v791_v50, 0.0  ;;  %v1323_v50 = vld [vmem:[%s2469_s8] ss:$0 sm:$0xff] }
 0x27b   : > { %v1482_v10 = vpop.f32.mrf.mxu0  ;;  %1531 = vmatmul.mubr.f32.gmra.mxu1 %v815_v49  ;;  %1605 = vmatprep.subr.mxu1 %v2338_v5 }
 0x27c   : > { %v816_v52 = vmax.f32 %v786_v51, 0.0  ;;  %1621 = vmatpush3.msra.mxu1 %v2338_v5  ;;  %v801_v54 = vadd.f32 %v1482_v10, %v2351_v30 }
 0x27d   : > { %v795_v57 = vpop.f32.mrf.mxu0  ;;  %1606 = vmatprep.subr.mxu1 %v2342_v6 }
 0x27e   : > { %v796_v11 = vadd.f32 %v2351_v30, %v795_v57  ;;  %1533 = vmatprep.mubr.f32.mxu1 %v816_v52  ;;  %1622 = vmatpush3.msra.mxu1 %v2342_v6  ;;  %v819_v25 = vmax.f32 %v801_v54, 0.0 }
 0x27f   : > { %1534 = vmatmul.mubr.f32.gmra.mxu1 %v817_v53  ;;  %1607 = vmatprep.subr.mxu1 %v1007_v29 }
 0x280   : > { %v818_v58 = vmax.f32 %v796_v11, 0.0  ;;  %1623 = vmatpush3.msra.mxu1 %v1007_v29 }
 0x281   : > { %1608 = vmatprep.subr.mxu1 %v1006_v59 }
 0x282   : > { %1536 = vmatprep.mubr.f32.mxu1 %v818_v58  ;;  %1624 = vmatpush3.msra.mxu1 %v1006_v59 }
 0x283   : > { %1537 = vmatmul.mubr.f32.gmra.mxu1 %v819_v25  ;;  %1609 = vmatprep.subr.mxu1 %v1005_v60 }
 0x284   : > { %1625 = vmatpush3.msra.mxu1 %v1005_v60 }
 0x285   : > { %1610 = vmatprep.subr.mxu1 %v1004_v13 }
 0x286   : > { %1626 = vmatpush3.msra.mxu1 %v1004_v13 }
 0x327   : > { %v1517_v26 = vpop.f32.mrf.mxu1 }
 0x328   : > { %v915_v32 = vadd.f32 %v1517_v26, %v1322_v23 }
 0x329   : > { %v909_v61 = vpop.f32.mrf.mxu1 }
 0x32a   : > { %v910_v62 = vadd.f32 %v1322_v23, %v909_v61  ;;  %v989_v3 = vmax.f32 %v915_v32, 0.0 }
 0x32b   : > { %v1520_v63 = vpop.f32.mrf.mxu1 }
 0x32c   : > { %v988_v2 = vmax.f32 %v910_v62, 0.0  ;;  %v925_v4 = vadd.f32 %v1520_v63, %v1322_v23 }
 0x32d   : > { %v919_v5 = vpop.f32.mrf.mxu1 }
 0x32e   : > { %v920_v6 = vadd.f32 %v1322_v23, %v919_v5  ;;  %1571 = vmatprep.mubr.f32.mxu0 %v988_v2  ;;  %v991_v8 = vmax.f32 %v925_v4, 0.0 }
 0x32f   : > { %v1523_v30 = vpop.f32.mrf.mxu1  ;;  %1572 = vmatmul.mubr.f32.vlgmr.msra.gmra.mxu0 %v989_v3 }
 0x330   : > { %v990_v7 = vmax.f32 %v920_v6, 0.0  ;;  %v935_v9 = vadd.f32 %v1523_v30, %v1322_v23 }
 0x331   : > { %v929_v37 = vpop.f32.mrf.mxu1 }
 0x332   : > { %v930_v16 = vadd.f32 %v1322_v23, %v929_v37  ;;  %1574 = vmatprep.mubr.f32.mxu0 %v990_v7  ;;  %v993_v19 = vmax.f32 %v935_v9, 0.0 }
 0x333   : > { %v1526_v17 = vpop.f32.mrf.mxu1  ;;  %1575 = vmatmul.mubr.f32.gmra.mxu0 %v991_v8 }
 0x334   : > { %v992_v18 = vmax.f32 %v930_v16, 0.0  ;;  %v945_v20 = vadd.f32 %v1526_v17, %v1322_v23 }
 0x335   : > { %v939_v21 = vpop.f32.mrf.mxu1 }
 0x336   : > { %v940_v24 = vadd.f32 %v1322_v23, %v939_v21  ;;  %1577 = vmatprep.mubr.f32.mxu0 %v992_v18  ;;  %v995_v27 = vmax.f32 %v945_v20, 0.0 }
 0x337   : > { %v1529_v12 = vpop.f32.mrf.mxu1  ;;  %1578 = vmatmul.mubr.f32.gmra.mxu0 %v993_v19 }
 0x338   : > { %v994_v38 = vmax.f32 %v940_v24, 0.0  ;;  %v955_v45 = vadd.f32 %v1529_v12, %v1322_v23 }
 0x339   : > { %v949_v28 = vpop.f32.mrf.mxu1 }
 0x33a   : > { %v950_v14 = vadd.f32 %v1322_v23, %v949_v28  ;;  %1580 = vmatprep.mubr.f32.mxu0 %v994_v38  ;;  %v997_v33 = vmax.f32 %v955_v45, 0.0 }
 0x33b   : > { %v1532_v31 = vpop.f32.mrf.mxu1  ;;  %1581 = vmatmul.mubr.f32.gmra.mxu0 %v995_v27 }
 0x33c   : > { %v996_v15 = vmax.f32 %v950_v14, 0.0  ;;  %v965_v34 = vadd.f32 %v1532_v31, %v1322_v23 }
 0x33d   : > { %v959_v35 = vpop.f32.mrf.mxu1 }
 0x33e   : > { %v960_v46 = vadd.f32 %v1322_v23, %v959_v35  ;;  %1583 = vmatprep.mubr.f32.mxu1 %v996_v15  ;;  %v999_v39 = vmax.f32 %v965_v34, 0.0 }
 0x33f   : > { %v1535_v55 = vpop.f32.mrf.mxu1  ;;  %1584 = vmatmul.mubr.f32.vlgmr.msra.gmra.mxu1 %v997_v33 }
 0x340   : > { %v998_v36 = vmax.f32 %v960_v46, 0.0  ;;  %v975_v40 = vadd.f32 %v1535_v55, %v1322_v23 }
 0x341   : > { %v969_v41 = vpop.f32.mrf.mxu1 }
 0x342   : > { %v970_v42 = vadd.f32 %v1322_v23, %v969_v41  ;;  %1586 = vmatprep.mubr.f32.mxu1 %v998_v36  ;;  %v1001_v43 = vmax.f32 %v975_v40, 0.0 }
 0x343   : > { %v1538_v22 = vpop.f32.mrf.mxu1  ;;  %1587 = vmatmul.mubr.f32.gmra.mxu1 %v999_v39 }
 0x344   : > { %v1000_v56 = vmax.f32 %v970_v42, 0.0  ;;  %v985_v0 = vadd.f32 %v1538_v22, %v1322_v23 }
 0x345   : > { %v979_v44 = vpop.f32.mrf.mxu1 }
 0x346   : > { %v980_v47 = vadd.f32 %v1322_v23, %v979_v44  ;;  %1589 = vmatprep.mubr.f32.mxu1 %v1000_v56  ;;  %v1003_v49 = vmax.f32 %v985_v0, 0.0 }
 0x347   : > { %1590 = vmatmul.mubr.f32.gmra.mxu1 %v1001_v43 }
 0x348   : > { %v1002_v48 = vmax.f32 %v980_v47, 0.0 }
 0x34a   : > { %1592 = vmatprep.mubr.f32.mxu1 %v1002_v48 }
 0x34b   : > { %1593 = vmatmul.mubr.f32.gmra.mxu1 %v1003_v49 }
 0x3ef   : > { %v1573_v1 = vpop.f32.mrf.mxu0 }
 0x3f0   : > { %v1099_v51 = vadd.f32 %v1573_v1, %v1323_v50 }
 0x3f1   : > { %v1093_v10 = vpop.f32.mrf.mxu0 }
 0x3f2   : > { %1173 = vst [vmem:[%s2393_s19 + $0x8] sm:$0xff] %v1099_v51  ;;  %v1094_v52 = vadd.f32 %v1323_v50, %v1093_v10 }
 0x3f3   : > { %v1576_v53 = vpop.f32.mrf.mxu0 }
 0x3f4   : > { %1172 = vst [vmem:[%s2393_s19] sm:$0xff] %v1094_v52  ;;  %v1109_v54 = vadd.f32 %v1576_v53, %v1323_v50 }
 0x3f5   : > { %v1103_v57 = vpop.f32.mrf.mxu0 }
 0x3f6   : > { %1175 = vst [vmem:[%s2393_s19 + $0x18] sm:$0xff] %v1109_v54  ;;  %v1104_v11 = vadd.f32 %v1323_v50, %v1103_v57 }
 0x3f7   : > { %v1579_v58 = vpop.f32.mrf.mxu0 }
 0x3f8   : > { %1174 = vst [vmem:[%s2393_s19 + $0x10] sm:$0xff] %v1104_v11  ;;  %v1119_v25 = vadd.f32 %v1579_v58, %v1323_v50 }
 0x3f9   : > { %v1113_v29 = vpop.f32.mrf.mxu0 }
 0x3fa   : > { %1177 = vst [vmem:[%s2393_s19 + $0x28] sm:$0xff] %v1119_v25  ;;  %v1114_v59 = vadd.f32 %v1323_v50, %v1113_v29 }
 0x3fb   : > { %v1582_v60 = vpop.f32.mrf.mxu0 }
 0x3fc   : > { %1176 = vst [vmem:[%s2393_s19 + $0x20] sm:$0xff] %v1114_v59  ;;  %v1129_v13 = vadd.f32 %v1582_v60, %v1323_v50 }
 0x3fd   : > { %v1123_v23 = vpop.f32.mrf.mxu0 }
 0x3fe   : > { %1179 = vst [vmem:[%s2393_s19 + $0x38] sm:$0xff] %v1129_v13  ;;  %v1124_v26 = vadd.f32 %v1323_v50, %v1123_v23 }
 0x3ff   : > { %v1585_v32 = vpop.f32.mrf.mxu1 }
 0x400   : > { %1178 = vst [vmem:[%s2393_s19 + $0x30] sm:$0xff] %v1124_v26  ;;  %v1139_v61 = vadd.f32 %v1585_v32, %v1323_v50 }
 0x401   : > { %v1133_v62 = vpop.f32.mrf.mxu1 }
 0x402   : > { %1181 = vst [vmem:[%s2393_s19 + $0x48] sm:$0xff] %v1139_v61  ;;  %v1134_v63 = vadd.f32 %v1323_v50, %v1133_v62 }
 0x403   : > { %v1588_v2 = vpop.f32.mrf.mxu1 }
 0x404   : > { %1180 = vst [vmem:[%s2393_s19 + $0x40] sm:$0xff] %v1134_v63  ;;  %v1149_v3 = vadd.f32 %v1588_v2, %v1323_v50 }
 0x405   : > { %v1143_v4 = vpop.f32.mrf.mxu1 }
 0x406   : > { %1183 = vst [vmem:[%s2393_s19 + $0x58] sm:$0xff] %v1149_v3  ;;  %v1144_v5 = vadd.f32 %v1323_v50, %v1143_v4 }
 0x407   : > { %v1591_v6 = vpop.f32.mrf.mxu1 }
 0x408   : > { %1182 = vst [vmem:[%s2393_s19 + $0x50] sm:$0xff] %v1144_v5  ;;  %v1159_v30 = vadd.f32 %v1591_v6, %v1323_v50 }
 0x409   : > { %v1153_v7 = vpop.f32.mrf.mxu1 }
 0x40a   : > { %1185 = vst [vmem:[%s2393_s19 + $0x68] sm:$0xff] %v1159_v30  ;;  %v1154_v8 = vadd.f32 %v1323_v50, %v1153_v7 }
 0x40b   : > { %v1594_v9 = vpop.f32.mrf.mxu1 }
 0x40c   : > { %1184 = vst [vmem:[%s2393_s19 + $0x60] sm:$0xff] %v1154_v8  ;;  %v1169_v37 = vadd.f32 %v1594_v9, %v1323_v50 }
 0x40d   : > { %v1163_v16 = vpop.f32.mrf.mxu1 }
 0x40e   : > { %1187 = vst [vmem:[%s2393_s19 + $0x78] sm:$0xff] %v1169_v37  ;;  %v1164_v17 = vadd.f32 %v1323_v50, %v1163_v16 }
 0x410   : > { %1186 = vst [vmem:[%s2393_s19 + $0x70] sm:$0xff] %v1164_v17 }
 0x411   : > { %1859 = shalt.err (!%p1856_p10)
}
 0x412   : > { %s1860_s20 = scalar_lea.hbm %s2414_s17, 2048  ;;  %s1864_s3 = scalar_lea.hbm %s2470_s9, 4096 }
 0x413   : > { %p1861_p6 = scmp.ne.s32.totalorder %s2414_s17, %s1860_s20  ;;  %p1865_p3 = scmp.lt.s32.totalorder %s2414_s17, %s2470_s9 }
 0x414   : > { %p1866_p11 = scmp.lt.s32.totalorder %s1864_s3, %s1860_s20 }
 0x415   : > { %p1862_p4 = pnand %p1861_p6, %p2497_p1 }
 0x416   : > { %p1867_p5 = por %p1866_p11, %p1865_p3 }
 0x417   : > { %p1863_p8 = pneg %p1862_p4 }
 0x419   : > { %p1868_p7 = pnand %p1867_p5, %p1863_p8 }
 0x41b   : > { %1871 = shalt.err (!%p1868_p7)
}
 0x41c   : > { %s1927_s26 = smov 128   ;;  %s1928_s15 = smov 8  }
 0x41d   : > { %1641 = dma.vmem_to_hbm [thread:$0]  (%p2497_p1), %s2416_s24, 2048, %s2414_s17, %s1189_s27, %s1927_s26, %s1927_s26, %s1928_s15  }
 0x41e PF: > { %s1217_s13 = sand.u32 1, %s1906_s30   ;;  %p2498_p12 = scmp.ne.s32.totalorder %s2481_s16, 0 }
 0x41f   : > { %p2499_p9 = scmp.ge.s32.totalorder %s1918_s12, 2  ;;  %s1218_s25 = scalar_lea.sflag [#allocation4], %s1217_s13 }
 0x421   : > { %p1658_p13 = pnand %p2499_p9, %p2498_p12 }
 0x423   : > { %p1659_p0 = pneg %p1658_p13 }
 0x425   : > { %1901 = dma.done.wait (%p1659_p0), %s1218_s25, 2048  }
 0x426   : > { %1903 = vsyncadd (%p1659_p0), %s1218_s25, 4294965248  ;;  %p24_p2 = scmp.ge.s32.totalorder %s2068_s22, 4   ;;  %s2500_s30 = smov %s1910_s10 }
 0x427   : > { %s2501_s10 = smov %s1914_s11  ;;  %s2502_s11 = smov %s2078_s29 }
 0x428   : > { %s2503_s12 = smov %s2068_s22  ;;  %26 = sbr.rel (!%p24_p2) target bundleno = 11 (0xb), region = 113 }
 0x42d   :  { %1223 = vsyncpa [#allocation3], 1 }
 0x42e   :  { %1225 = vsyncpa [#allocation3 + $0x1], 1 }
 0x42f   :  { %1226 = vsyncpa [#allocation6], 1 }
 0x430   :  { %1227 = vsyncpa [#allocation9], 1 }
 0x431   :  { %1228 = vsyncpa [#allocation4], 1 }
 0x432   :  { %1230 = vsyncpa [#allocation4 + $0x1], 1 }

</bundles_post_ra>
